<compile_context>
chip_gen: v5e
topology: v5e:2x2
jax: 0.10.0
libtpu: 0.0.40
codegen_flags: <defaults>
</compile_context>

<pallas_src>
import jax
import jax.numpy as jnp
from jax import lax
from jax.experimental import pallas as pl
from jax.experimental.pallas import tpu as pltpu


def attention_kernel(enc_ref, de_ref, mask_ref, wh_ref, v_ref, ctx_ref, attw_ref):
    # enc_ref : (Bb, S, 2H) encoder outputs for this block of batch rows
    # de_ref  : (Bb, 2H)    precomputed Ws(s_t) + b   (hoisted to the wrapper)
    # mask_ref: (Bb, S)     0/1 pad mask, seq on the lane axis
    # wh_ref  : (2H, 2H)    Wh weight in nn.Linear (out, in) layout (no .T in wrapper)
    # v_ref   : (1, 2H)     v weight as a row (nn.Linear(2H, 1).weight)
    # ctx_ref : (Bb, 2H)    context output
    # attw_ref: (Bb, S)     attention weights, lane-dense
    Bb, S, D2 = enc_ref.shape
    enc = enc_ref[...]                                                 # (Bb, S, 2H)
    wh = wh_ref[...]                                                   # (2H_out, 2H_in)

    # en_features = enc @ Wh^T.  Contract enc's feature dim with Wh's *input*
    # dim so the (out, in) weight is consumed natively by the MXU.
    if S % 8 == 0:
        # sublane-aligned collapse -> one (Bb*S, 2H) @ (2H, 2H) MXU matmul
        en_feat = lax.dot_general(
            enc.reshape(Bb * S, D2), wh,
            dimension_numbers=(((1,), (1,)), ((), ())),
            preferred_element_type=jnp.float32).reshape(Bb, S, D2)
    else:
        # unaligned reshape would materialize a VMEM relayout copy; keep batched
        en_feat = lax.dot_general(
            enc, wh,
            dimension_numbers=(((2,), (1,)), ((), ())),
            preferred_element_type=jnp.float32)

    # add broadcast decoder features, tanh (EUP)
    att_in = jnp.tanh(en_feat + de_ref[...][:, None, :])               # (Bb, S, 2H)

    # score = tanh(.) @ v^T done as VPU multiply + lane reduce (no N=1 matmul)
    score = jnp.sum(att_in * v_ref[...], axis=-1)                      # (Bb, S)

    # fused masked softmax over the sequence axis (mask is strictly 0/1, so
    # exp(score-m)*mask / sum == softmax -> mask -> renorm exactly)
    m = jnp.max(score, axis=-1, keepdims=True)                         # (Bb, 1)
    e = jnp.exp(score - m) * mask_ref[...]                             # (Bb, S)
    w = e / jnp.sum(e, axis=-1, keepdims=True)                         # (Bb, S)

    # context_b = sum_s w[b, s] * enc[b, s, :]   (VPU mul + sublane reduce)
    ctx = jnp.sum(w[:, :, None] * enc, axis=1)                         # (Bb, 2H)

    ctx_ref[...] = ctx.astype(ctx_ref.dtype)
    attw_ref[...] = w.astype(attw_ref.dtype)


def _round_up(x, m):
    return ((x + m - 1) // m) * m


def _round_down_to_mult(x, m):
    return max(m, (x // m) * m)


def _tpu_vmem_and_cores():
    """Best-effort query of per-core VMEM capacity and TensorCores per chip."""
    vmem_bytes = None
    num_cores = 1
    try:
        vmem_bytes = int(pltpu.get_tpu_info().vmem_capacity_bytes)
    except Exception:
        pass
    try:
        kind = jax.devices()[0].device_kind.lower()
        if ("v5" in kind) or ("v6" in kind):
            num_cores = 1
        elif "7" in kind:
            num_cores = 2
    except Exception:
        pass
    if vmem_bytes is None:
        vmem_bytes = 64 << 20   # conservative fallback = v7x per-TC capacity
    return vmem_bytes, num_cores


def _pick_block_batch(B, S, D2, vmem_bytes, num_cores):
    """VMEM-driven block-batch selection.

    Returns (bb, B_padded, vmem_limit_bytes) with bb a multiple of 8 and
    bb | B_padded, sized so the double-buffered streamed operands fit the
    per-generation VMEM budget.
    """
    if vmem_bytes >= (96 << 20):          # v5e / v6e: 128 MiB physical VMEM
        block_budget = 80 << 20
        vmem_limit = 100 << 20
    else:                                 # v7x: 64 MiB physical, 32 MiB scoped default
        block_budget = 40 << 20
        vmem_limit = 48 << 20

    # f32 bytes per batch row of the streamed (double-buffered) operands:
    # enc (S*D2) + de_feat (D2) + mask (S) + ctx out (D2) + attw out (S)
    stream_row = (S * D2 + D2 + S + D2 + S) * 4
    per_row = stream_row * 2
    const_bytes = (D2 * D2 + D2) * 4      # Wh (single-buffered) + v row
    avail = max(block_budget - const_bytes, per_row * 8)
    bb_cap = max(8, int(avail // per_row))

    B_pad = _round_up(B, 8)               # fill all 8 sublanes, unmasked stores
    bb = min(bb_cap, B_pad)
    bb = _round_down_to_mult(bb, 8)
    bb = min(bb, B_pad)

    # Dual-TC parts (v7x): only split the grid when each half still feeds the
    # MXU a healthy M (bb*S >= 256) and stays sublane-full.
    if num_cores >= 2 and bb >= B_pad and B_pad >= 16 and (B_pad // 2) * S >= 256:
        bb = _round_down_to_mult(B_pad // 2, 8)

    B_pad = _round_up(B_pad, bb)          # guarantee bb | B_pad (no partial blocks)
    return bb, B_pad, vmem_limit


def _const_spec(shape):
    """BlockSpec for a grid-constant operand, single-buffered when supported."""
    index_map = lambda b: tuple(0 for _ in shape)
    buffered = getattr(pl, "Buffered", None)
    if buffered is not None:
        try:
            return pl.BlockSpec(shape, index_map, pipeline_mode=buffered(1))
        except TypeError:
            pass
    return pl.BlockSpec(shape, index_map)


def attention_forward(params, hidden, cell, enc_output, pad_masks):
    """Pallas implementation of Attention.forward.

    hidden, cell : (1, B, H)     (reduced LSTM state)
    enc_output   : (B, S, 2H)    (bidirectional encoder output)
    pad_masks    : (B, S)
    returns      : context (B, 2H), att_weights (B, S)
    """
    B, S, D2 = enc_output.shape                  # D2 = 2H

    # s_t = cat([hidden, cell], dim=2).transpose(0, 1) -> (B, 2H)
    s_vec = jnp.concatenate([hidden, cell], axis=2).transpose(1, 0, 2).reshape(B, D2)
    # Hoisted decoder-state projection: one batched matmul outside the kernel.
    de_feat = (s_vec @ params["Ws_w"].T + params["Ws_b"][None, :]).astype(jnp.float32)

    enc = enc_output.astype(jnp.float32)
    mask = pad_masks.astype(jnp.float32)         # (B, S) lane-dense

    vmem_bytes, num_cores = _tpu_vmem_and_cores()
    bb, B_pad, vmem_limit = _pick_block_batch(B, S, D2, vmem_bytes, num_cores)

    if B_pad != B:
        pad = B_pad - B
        enc = jnp.pad(enc, ((0, pad), (0, 0), (0, 0)))
        de_feat = jnp.pad(de_feat, ((0, pad), (0, 0)))
        # padded rows get an all-ones mask so their (discarded) math stays finite
        mask = jnp.pad(mask, ((0, pad), (0, 0)), constant_values=1.0)

    grid = (B_pad // bb,)

    # TODO(synk): optional bf16 cast of enc/Wh for the MXU matmul once D2 is
    # large enough to be MXU-bound and the 1e-4 tolerance can be relaxed.
    ctx, attw = pl.pallas_call(
        attention_kernel,
        out_shape=(
            jax.ShapeDtypeStruct((B_pad, D2), jnp.float32),
            jax.ShapeDtypeStruct((B_pad, S), jnp.float32),
        ),
        grid_spec=pltpu.PrefetchScalarGridSpec(
            num_scalar_prefetch=0,
            grid=grid,
            in_specs=[
                pl.BlockSpec((bb, S, D2), lambda b: (b, 0, 0)),   # enc_output
                pl.BlockSpec((bb, D2), lambda b: (b, 0)),         # de_feat
                pl.BlockSpec((bb, S), lambda b: (b, 0)),          # pad mask
                _const_spec((D2, D2)),                            # Wh (single-buffered)
                _const_spec((1, D2)),                             # v row (single-buffered)
            ],
            out_specs=[
                pl.BlockSpec((bb, D2), lambda b: (b, 0)),         # context
                pl.BlockSpec((bb, S), lambda b: (b, 0)),          # att weights
            ],
        ),
        compiler_params=pltpu.CompilerParams(
            dimension_semantics=("parallel",),
            vmem_limit_bytes=vmem_limit),
    )(enc, de_feat, mask,
      params["Wh_w"].astype(jnp.float32),
      params["v_w"].reshape(1, D2).astype(jnp.float32))

    return ctx[:B], attw[:B]


def attention_reference(params, hidden, cell, enc_output, pad_masks):
    """Pure-JAX reference matching the PyTorch forward exactly."""
    B, S, D2 = enc_output.shape
    s_t = jnp.concatenate([hidden, cell], axis=2)          # (1, B, 2H)
    s_t = jnp.transpose(s_t, (1, 0, 2))                    # (B, 1, 2H)
    s_t = jnp.broadcast_to(s_t, (B, S, D2))                # expand_as(output)
    en_features = enc_output @ params["Wh_w"].T
    de_features = s_t @ params["Ws_w"].T + params["Ws_b"]
    score = jnp.tanh(en_features + de_features) @ params["v_w"].T   # (B, S, 1)
    att_weights = jax.nn.softmax(score, axis=1)[..., 0]             # (B, S)
    att_weights = att_weights * pad_masks
    att_weights = att_weights / jnp.sum(att_weights, axis=1, keepdims=True)
    context = jnp.einsum("bs,bsd->bd", att_weights, enc_output)
    return context, att_weights


def init_params(key, hidden_dim):
    d2 = 2 * hidden_dim
    k1, k2, k3, k4 = jax.random.split(key, 4)
    bound = 1.0 / jnp.sqrt(d2)
    return {
        "Wh_w": jax.random.uniform(k1, (d2, d2), jnp.float32, -bound, bound),
        "Ws_w": jax.random.uniform(k2, (d2, d2), jnp.float32, -bound, bound),
        "Ws_b": jax.random.uniform(k3, (d2,), jnp.float32, -bound, bound),
        "v_w": jax.random.uniform(k4, (1, d2), jnp.float32, -bound, bound),
    }


if __name__ == "__main__":
    B, S, H = 2, 8, 32                      # batch, seq len, hidden_dim
    key = jax.random.PRNGKey(0)
    kp, kh, kc, ko = jax.random.split(key, 4)

    params = init_params(kp, H)
    hidden = jax.random.normal(kh, (1, B, H), jnp.float32)
    cell = jax.random.normal(kc, (1, B, H), jnp.float32)
    enc_output = jax.random.normal(ko, (B, S, 2 * H), jnp.float32)
    # mark the last position of batch 1 as padding to exercise the mask path
    pad_masks = jnp.ones((B, S), jnp.float32).at[1, S - 1].set(0.0)

    ctx, attw = attention_forward(params, hidden, cell, enc_output, pad_masks)
    jax.block_until_ready((ctx, attw))

    ctx_ref, attw_ref = attention_reference(params, hidden, cell, enc_output, pad_masks)
    assert jnp.allclose(ctx, ctx_ref, atol=1e-4, rtol=1e-4)
    assert jnp.allclose(attw, attw_ref, atol=1e-5, rtol=1e-5)

    print("KERNEL_OK")
</pallas_src>

<mosaic_0001>
module attributes {stable_mosaic.version = 11 : i64} {
  func.func @attention_kernel(%arg0: i32, %arg1: memref<8x8x64xf32, #tpu.memory_space<vmem>>, %arg2: memref<8x64xf32, #tpu.memory_space<vmem>>, %arg3: memref<8x8xf32, #tpu.memory_space<vmem>>, %arg4: memref<64x64xf32, #tpu.memory_space<vmem>>, %arg5: memref<1x64xf32, #tpu.memory_space<vmem>>, %arg6: memref<8x64xf32, #tpu.memory_space<vmem>>, %arg7: memref<8x8xf32, #tpu.memory_space<vmem>>) attributes {dimension_semantics = [#tpu.dimension_semantics<parallel>], iteration_bounds = array<i64: 1>, scalar_prefetch = 0 : i64, scratch_operands = 0 : i64, tpu.core_type = #tpu.core_type<tc>, window_params = [{transform_indices = @transform_0, window_bounds = array<i64: 8, 8, 64>}, {transform_indices = @transform_1, window_bounds = array<i64: 8, 64>}, {transform_indices = @transform_2, window_bounds = array<i64: 8, 8>}, {pipeline_mode = #tpu.pipeline_mode<synchronous>, transform_indices = @transform_3, window_bounds = array<i64: 64, 64>}, {pipeline_mode = #tpu.pipeline_mode<synchronous>, transform_indices = @transform_4, window_bounds = array<i64: 1, 64>}, {transform_indices = @transform_5, window_bounds = array<i64: 8, 64>}, {transform_indices = @transform_6, window_bounds = array<i64: 8, 8>}]} {
    %c0 = arith.constant 0 : index
    %c0_0 = arith.constant 0 : index
    %c0_1 = arith.constant 0 : index
    %0 = vector.load %arg1[%c0, %c0_0, %c0_1] : memref<8x8x64xf32, #tpu.memory_space<vmem>>, vector<8x8x64xf32>
    %c0_2 = arith.constant 0 : index
    %c0_3 = arith.constant 0 : index
    %1 = vector.load %arg4[%c0_2, %c0_3] : memref<64x64xf32, #tpu.memory_space<vmem>>, vector<64x64xf32>
    %2 = vector.shape_cast %0 : vector<8x8x64xf32> to vector<64x64xf32>
    %cst = arith.constant dense<0.000000e+00> : vector<64x64xf32>
    %3 = tpu.matmul %2, %1, %cst {dimension_numbers = #tpu.dot_dimension_numbers<[1], [1], [0], [0], [0, 0, 1, 0], [], []>} : vector<64x64xf32>, vector<64x64xf32>, vector<64x64xf32> -> vector<64x64xf32>
    %4 = vector.shape_cast %3 : vector<64x64xf32> to vector<8x8x64xf32>
    %c0_4 = arith.constant 0 : index
    %c0_5 = arith.constant 0 : index
    %5 = vector.load %arg2[%c0_4, %c0_5] : memref<8x64xf32, #tpu.memory_space<vmem>>, vector<8x64xf32>
    %6 = vector.shape_cast %5 : vector<8x64xf32> to vector<8x1x64xf32>
    %7 = vector.broadcast %6 : vector<8x1x64xf32> to vector<8x8x64xf32>
    %8 = arith.addf %4, %7 : vector<8x8x64xf32>
    %9 = math.tanh %8 : vector<8x8x64xf32>
    %c0_6 = arith.constant 0 : index
    %c0_7 = arith.constant 0 : index
    %10 = vector.load %arg5[%c0_6, %c0_7] : memref<1x64xf32, #tpu.memory_space<vmem>>, vector<1x64xf32>
    %11 = vector.shape_cast %10 : vector<1x64xf32> to vector<1x1x64xf32>
    %12 = vector.broadcast %11 : vector<1x1x64xf32> to vector<8x8x64xf32>
    %13 = arith.mulf %9, %12 : vector<8x8x64xf32>
    %cst_8 = arith.constant dense<0.000000e+00> : vector<8x8xf32>
    %14 = vector.multi_reduction <add>, %13, %cst_8 [2] : vector<8x8x64xf32> to vector<8x8xf32>
    %cst_9 = arith.constant dense<0xFF800000> : vector<8xf32>
    %15 = vector.multi_reduction <maximumf>, %14, %cst_9 [1] : vector<8x8xf32> to vector<8xf32>
    %16 = vector.shape_cast %15 : vector<8xf32> to vector<8x1xf32>
    %17 = vector.broadcast %16 : vector<8x1xf32> to vector<8x8xf32>
    %18 = arith.subf %14, %17 : vector<8x8xf32>
    %19 = math.exp %18 : vector<8x8xf32>
    %c0_10 = arith.constant 0 : index
    %c0_11 = arith.constant 0 : index
    %20 = vector.load %arg3[%c0_10, %c0_11] : memref<8x8xf32, #tpu.memory_space<vmem>>, vector<8x8xf32>
    %21 = arith.mulf %19, %20 : vector<8x8xf32>
    %cst_12 = arith.constant dense<0.000000e+00> : vector<8xf32>
    %22 = vector.multi_reduction <add>, %21, %cst_12 [1] : vector<8x8xf32> to vector<8xf32>
    %23 = vector.shape_cast %22 : vector<8xf32> to vector<8x1xf32>
    %24 = vector.broadcast %23 : vector<8x1xf32> to vector<8x8xf32>
    %25 = arith.divf %21, %24 : vector<8x8xf32>
    %26 = vector.shape_cast %25 : vector<8x8xf32> to vector<8x8x1xf32>
    %27 = vector.broadcast %26 : vector<8x8x1xf32> to vector<8x8x64xf32>
    %28 = arith.mulf %27, %0 : vector<8x8x64xf32>
    %cst_13 = arith.constant dense<0.000000e+00> : vector<8x64xf32>
    %29 = vector.multi_reduction <add>, %28, %cst_13 [1] : vector<8x8x64xf32> to vector<8x64xf32>
    %c0_14 = arith.constant 0 : index
    %c0_15 = arith.constant 0 : index
    %30 = vector.load %arg6[%c0_14, %c0_15] : memref<8x64xf32, #tpu.memory_space<vmem>>, vector<8x64xf32>
    tpu.vector_store %arg6[%c0_14, %c0_15], %29 {strides = array<i32>} : memref<8x64xf32, #tpu.memory_space<vmem>>, vector<8x64xf32>,
    %c0_16 = arith.constant 0 : index
    %c0_17 = arith.constant 0 : index
    %31 = vector.load %arg7[%c0_16, %c0_17] : memref<8x8xf32, #tpu.memory_space<vmem>>, vector<8x8xf32>
    tpu.vector_store %arg7[%c0_16, %c0_17], %25 {strides = array<i32>} : memref<8x8xf32, #tpu.memory_space<vmem>>, vector<8x8xf32>,
    return
  }
  func.func @transform_0(%arg0: i32) -> (i32, i32, i32) {
    %c0_i32 = arith.constant 0 : i32
    %c0_i32_0 = arith.constant 0 : i32
    %c0_i32_1 = arith.constant 0 : i32
    return %arg0, %c0_i32, %c0_i32_0 : i32, i32, i32
  }
  func.func @transform_1(%arg0: i32) -> (i32, i32) {
    %c0_i32 = arith.constant 0 : i32
    %c0_i32_0 = arith.constant 0 : i32
    return %arg0, %c0_i32 : i32, i32
  }
  func.func @transform_2(%arg0: i32) -> (i32, i32) {
    %c0_i32 = arith.constant 0 : i32
    %c0_i32_0 = arith.constant 0 : i32
    return %arg0, %c0_i32 : i32, i32
  }
  func.func @transform_3(%arg0: i32) -> (i32, i32) {
    %c0_i32 = arith.constant 0 : i32
    %c0_i32_0 = arith.constant 0 : i32
    %c0_i32_1 = arith.constant 0 : i32
    return %c0_i32, %c0_i32_0 : i32, i32
  }
  func.func @transform_4(%arg0: i32) -> (i32, i32) {
    %c0_i32 = arith.constant 0 : i32
    %c0_i32_0 = arith.constant 0 : i32
    %c0_i32_1 = arith.constant 0 : i32
    return %c0_i32, %c0_i32_0 : i32, i32
  }
  func.func @transform_5(%arg0: i32) -> (i32, i32) {
    %c0_i32 = arith.constant 0 : i32
    %c0_i32_0 = arith.constant 0 : i32
    return %arg0, %c0_i32 : i32, i32
  }
  func.func @transform_6(%arg0: i32) -> (i32, i32) {
    %c0_i32 = arith.constant 0 : i32
    %c0_i32_0 = arith.constant 0 : i32
    return %arg0, %c0_i32 : i32, i32
  }
}

</mosaic_0001>

<bundles_post_ra>
// kernel: tpu_custom_call.1
= control target key start
LH: loop header
LB: loop body
LE: loop exit
PB: predicated region body
PF: predicated region fallthrough
CT: control target
= control target key end

     0   :  { %12 = vsyncpa [#allocation3], 0  ;;  %s1384_s0 = inlined_call_operand.hbm [shape: f32[8,8,64], index: 0, kind: input, shape index: {}]   ;;  %s1385_s1 = inlined_call_operand.hbm [shape: f32[8,64], index: 1, kind: input, shape index: {}]   ;;  %s1386_s2 = inlined_call_operand.hbm [shape: f32[8,8], index: 2, kind: input, shape index: {}]   ;;  %s1387_s3 = inlined_call_operand.hbm [shape: f32[64,64], index: 3, kind: input, shape index: {}]   ;;  %s1388_s4 = inlined_call_operand.vmem [shape: f32[1,64], index: 4, kind: input, shape index: {}]   ;;  %s1389_s5 = inlined_call_operand.hbm [shape: f32[8,64], index: 5, kind: output, shape index: {0}]   ;;  %s1390_s6 = inlined_call_operand.hbm [shape: f32[8,8], index: 6, kind: output, shape index: {1}]  }
   0x1   :  { %13 = vsyncpa [#allocation6], 0 }
   0x2   :  { %14 = vsyncpa [#allocation9], 0 }
   0x3   :  { %15 = vsyncpa [#allocation4], 0  ;;  %s35_s23 = sshll.u32 %s1385_s1, 4  ;;  %s36_s23 = int_to_ptr.hbm [resolvable:$true] %s35_s23 }
   0x4   :  { %16 = vsyncpa [#allocation12], 0  ;;  %s1037_s24 = smov [#allocation5]   ;;  %s21_s28 = sshll.u32 %s1384_s0, 4  ;;  %s22_s28 = int_to_ptr.hbm [resolvable:$true] %s21_s28 }
   0x5   :  { %s37_s25 = sshll.u32 %s1037_s24, 4  ;;  %s1038_s29 = smov [#allocation2]   ;;  %s38_s25 = int_to_ptr.vmem [resolvable:$true] %s37_s25 }
   0x6   :  { %40 = dma.hbm_to_vmem [thread:$0]  %s36_s23, 128, %s38_s25, [#allocation6]  }
   0x7   :  { %s23_s30 = sshll.u32 %s1038_s29, 4  ;;  %s1039_s7 = smov 128   ;;  %s24_s30 = int_to_ptr.vmem [resolvable:$true] %s23_s30 }
   0x8   :  { %s1040_s8 = smov 8   ;;  %s46_s1 = sshll.u32 %s1386_s2, 4  ;;  %s47_s1 = int_to_ptr.hbm [resolvable:$true] %s46_s1 }
   0x9   :  { %29 = dma.hbm_to_vmem [thread:$0]  %s22_s28, 1024, %s24_s30, [#allocation3], %s1039_s7, %s1039_s7, %s1040_s8  }
   0xa   :  { %s1041_s11 = smov [#allocation7]   ;;  %s56_s0 = sshll.u32 %s1387_s3, 4  ;;  %s57_s0 = int_to_ptr.hbm [resolvable:$true] %s56_s0 }
   0xb   :  { %s48_s12 = sshll.u32 %s1041_s11, 4  ;;  %s1042_s15 = smov [#allocation8]   ;;  %s49_s12 = int_to_ptr.vmem [resolvable:$true] %s48_s12 }
   0xc   :  { %51 = dma.hbm_to_vmem [thread:$0]  %s47_s1, 128, %s49_s12, [#allocation6]  }
   0xd   :  { %s58_s16 = sshll.u32 %s1042_s15, 4  ;;  %s59_s16 = int_to_ptr.vmem [resolvable:$true] %s58_s16 }
   0xe   :  { %64 = dma.hbm_to_vmem [thread:$0]  %s57_s0, 1024, %s59_s16, [#allocation9], %s1039_s7, %s1039_s7, %s1040_s8  }
   0xf   :  { %1027 = dma.done.wait [#allocation3], 1024  }
  0x10   :  { %1028 = vsyncadd [#allocation3], 4294966272 }
  0x11   :  { %1029 = dma.done.wait [#allocation6], 256  }
  0x12   :  { %1030 = vsyncadd [#allocation6], 4294967040 }
  0x13   :  { %1031 = dma.done.wait [#allocation9], 1024  }
  0x14   :  { %1032 = vsyncadd [#allocation9], 4294966272  ;;  %vm99_vm0 = vcmask 523264   ;;  %v98_v0 = vld [vmem:[#allocation8 + $0x38] sm:$0xff]  ;;  %v97_v1 = vld [vmem:[#allocation8 + $0x30] sm:$0xff]  ;;  %v274_v20 = vlaneseq  ;;  %vm284_vm1 = vcmask 1041409  }
  0x15   :  { %779 = vmatpush.xpose.msk.msra.mxu0 %vm99_vm0, %v98_v0  ;;  %796 = vmatpush.xpose.msk.msra.mxu2 %vm99_vm0, %v98_v0  ;;  %v96_v2 = vld [vmem:[#allocation8 + $0x28] sm:$0xff]  ;;  %v95_v3 = vld [vmem:[#allocation8 + $0x20] sm:$0xff]  ;;  %v94_v4 = vld [vmem:[#allocation8 + $0x18] sm:$0xff]  ;;  %vm286_vm2 = vcmask 1042434   ;;  %vm288_vm3 = vcmask 1043459   ;;  %vm290_vm4 = vcmask 1044484  }
  0x16   :  { %795 = vmatpush.xpose.msk.msra.mxu1 %vm99_vm0, %v98_v0  ;;  %797 = vmatpush.xpose.msk.msra.mxu3 %vm99_vm0, %v98_v0  ;;  %v93_v5 = vld [vmem:[#allocation8 + $0x10] sm:$0xff]  ;;  %v92_v6 = vld [vmem:[#allocation8 + $0x8] sm:$0xff]  ;;  %v91_v7 = vld [vmem:[#allocation8] sm:$0xff]  ;;  %v348_v23 = vshrl.u32 %v274_v20, 7  ;;  %vm292_vm5 = vcmask 1045509   ;;  %vm1393_vm6 = vcmask 1046534  }
  0x17   :  { %v1123_v8 = vld [vmem:[#allocation2] sm:$0xff]  ;;  %v1129_v10 = vld [vmem:[#allocation2 + $0x10] sm:$0xff]  ;;  %v1141_v12 = vld [vmem:[#allocation2 + $0x8] sm:$0xff]  ;;  %vm1392_vm7 = vcmask 1047559   ;;  %vm1391_vm8 = vcmask 64512   ;;  %s762_s20 = sshll.u32 %s1390_s6, 4  ;;  %s763_s20 = int_to_ptr.hbm [resolvable:$true] %s762_s20 }
  0x18   :  { %v1125_v9 = vld [vmem:[#allocation2 + $0x20] sm:$0xff]  ;;  %v1131_v11 = vld [vmem:[#allocation2 + $0x30] sm:$0xff]  ;;  %v1143_v13 = vld [vmem:[#allocation2 + $0x28] sm:$0xff]  ;;  %830 = vset.pattern.permute.xlu2 %v348_v23  ;;  %829 = vset.pattern.permute.xlu1 %v348_v23  ;;  %s1045_s6 = smov [#allocation10]   ;;  %s751_s24 = sshll.u32 %s1389_s5, 4  ;;  %s752_s24 = int_to_ptr.hbm [resolvable:$true] %s751_s24 }
  0x19   :  { %780 = vmatpush.xpose.msk.msra.mxu0 %vm99_vm0, %v97_v1  ;;  %799 = vmatpush.xpose.msk.msra.mxu2 %vm99_vm0, %v97_v1  ;;  %v1145_v14 = vld [vmem:[#allocation2 + $0x18] sm:$0xff]  ;;  %v189_v16 = vld [vmem:[#allocation5] sm:$0xff]  ;;  %s749_s21 = sshll.u32 %s1045_s6, 4  ;;  %s750_s21 = int_to_ptr.vmem [resolvable:$true] %s749_s21 }
  0x1a   :  { %798 = vmatpush.xpose.msk.msra.mxu1 %vm99_vm0, %v97_v1  ;;  %800 = vmatpush.xpose.msk.msra.mxu3 %vm99_vm0, %v97_v1  ;;  %v1147_v15 = vld [vmem:[#allocation2 + $0x38] sm:$0xff]  ;;  %v192_v17 = vrot.slane %v189_v16, 2  ;;  %v198_v18 = vperm.slane %v189_v16, 0  ;;  %v194_v21 = vrot.slane %v189_v16, 4  ;;  %v191_v26 = vrot.slane %v189_v16, 1 }
  0x1b   :  { %v193_v28 = vrot.slane %v189_v16, 3  ;;  %v196_v30 = vrot.slane %v189_v16, 6  ;;  %828 = vset.pattern.permute.xlu0 %v348_v23  ;;  %v834_v34 = vld [vmem:[%s1388_s4] ss:$0 sm:$0xff]  ;;  %v195_v38 = vrot.slane %v189_v16, 5  ;;  %v197_v40 = vrot.slane %v189_v16, 7 }
  0x1c   :  { %v200_v19 = vperm.slane %v192_v17, 0  ;;  %v202_v29 = vperm.slane %v194_v21, 0  ;;  %v199_v31 = vperm.slane %v191_v26, 0  ;;  %s1044_s4 = smov [#allocation11]  }
  0x1d   :  { %781 = vmatpush.xpose.msk.msra.mxu0 %vm99_vm0, %v96_v2  ;;  %802 = vmatpush.xpose.msk.msra.mxu2 %vm99_vm0, %v96_v2  ;;  %v201_v33 = vperm.slane %v193_v28, 0  ;;  %v204_v37 = vperm.slane %v196_v30, 0  ;;  %v203_v48 = vperm.slane %v195_v38, 0  ;;  %v205_v51 = vperm.slane %v197_v40, 0  ;;  %s760_s17 = sshll.u32 %s1044_s4, 4  ;;  %s761_s17 = int_to_ptr.vmem [resolvable:$true] %s760_s17 }
  0x1e   :  { %801 = vmatpush.xpose.msk.msra.mxu1 %vm99_vm0, %v96_v2  ;;  %803 = vmatpush.xpose.msk.msra.mxu3 %vm99_vm0, %v96_v2  ;;  %v1170_v30 = vand.u32 127, %v274_v20 }
  0x21   :  { %782 = vmatpush.xpose.msk.msra.mxu0 %vm99_vm0, %v95_v3  ;;  %805 = vmatpush.xpose.msk.msra.mxu2 %vm99_vm0, %v95_v3 }
  0x22   :  { %804 = vmatpush.xpose.msk.msra.mxu1 %vm99_vm0, %v95_v3  ;;  %806 = vmatpush.xpose.msk.msra.mxu3 %vm99_vm0, %v95_v3 }
  0x25   :  { %783 = vmatpush.xpose.msk.msra.mxu0 %vm99_vm0, %v94_v4  ;;  %808 = vmatpush.xpose.msk.msra.mxu2 %vm99_vm0, %v94_v4 }
  0x26   :  { %807 = vmatpush.xpose.msk.msra.mxu1 %vm99_vm0, %v94_v4  ;;  %809 = vmatpush.xpose.msk.msra.mxu3 %vm99_vm0, %v94_v4 }
  0x29   :  { %784 = vmatpush.xpose.msk.msra.mxu0 %vm99_vm0, %v93_v5  ;;  %811 = vmatpush.xpose.msk.msra.mxu2 %vm99_vm0, %v93_v5 }
  0x2a   :  { %810 = vmatpush.xpose.msk.msra.mxu1 %vm99_vm0, %v93_v5  ;;  %812 = vmatpush.xpose.msk.msra.mxu3 %vm99_vm0, %v93_v5 }
  0x2d   :  { %785 = vmatpush.xpose.msk.msra.mxu0 %vm99_vm0, %v92_v6  ;;  %814 = vmatpush.xpose.msk.msra.mxu2 %vm99_vm0, %v92_v6 }
  0x2e   :  { %813 = vmatpush.xpose.msk.msra.mxu1 %vm99_vm0, %v92_v6  ;;  %815 = vmatpush.xpose.msk.msra.mxu3 %vm99_vm0, %v92_v6 }
  0x31   :  { %786 = vmatpush.xpose.msk.msra.mxu0 %vm99_vm0, %v91_v7  ;;  %817 = vmatpush.xpose.msk.msra.mxu2 %vm99_vm0, %v91_v7 }
  0x32   :  { %816 = vmatpush.xpose.msk.msra.mxu1 %vm99_vm0, %v91_v7  ;;  %818 = vmatpush.xpose.msk.msra.mxu3 %vm99_vm0, %v91_v7 }
  0x34   :  { %787 = vmatmul.msk.f32.vlgmr.msra.gmra.mxu0 %vm99_vm0, %v1123_v8  ;;  %791 = vmatmul.msk.f32.vlgmr.msra.gmra.mxu2 %vm99_vm0, %v1125_v9 }
  0x35   :  { %789 = vmatmul.msk.f32.vlgmr.msra.gmra.mxu1 %vm99_vm0, %v1129_v10  ;;  %793 = vmatmul.msk.f32.vlgmr.msra.gmra.mxu3 %vm99_vm0, %v1131_v11 }
  0x3c   :  { %788 = vmatmul.msk.f32.gmra.mxu0 %vm99_vm0, %v1141_v12  ;;  %792 = vmatmul.msk.f32.gmra.mxu2 %vm99_vm0, %v1143_v13 }
  0x3d   :  { %790 = vmatmul.msk.f32.gmra.mxu1 %vm99_vm0, %v1145_v14  ;;  %794 = vmatmul.msk.f32.gmra.mxu3 %vm99_vm0, %v1147_v15 }
  0xb1   :  { %v165_v22 = vpop.f32.mrf.mxu0 }
  0xb2   :  { %v214_v24 = vadd.f32 %v198_v18, %v165_v22  ;;  %v171_v25 = vpop.f32.mrf.mxu1 }
  0xb3   :  { %v216_v27 = vadd.f32 %v200_v19, %v171_v25  ;;  %v344_v19 = vld [vmem:[#allocation7] sm:$0xff] }
  0xb4   :  { %835 = vtanh.f32 %v214_v24  ;;  %v360_v21 = vperm.slane %v344_v19, 2  ;;  %v367_v22 = vperm.slane %v344_v19, 3  ;;  %v353_v23 = vperm.slane %v344_v19, 1 }
  0xb5   :  { %837 = vtanh.f32 %v216_v27  ;;  %v346_v24 = vperm.slane %v344_v19, 0  ;;  %v374_v25 = vperm.slane %v344_v19, 4  ;;  %v395_v26 = vperm.slane %v344_v19, 7 }
  0xb6   :  { %v388_v28 = vperm.slane %v344_v19, 6 }
  0xb7   :  { %v177_v32 = vpop.f32.mrf.mxu2 }
  0xb8   :  { %v218_v35 = vadd.f32 %v202_v29, %v177_v32  ;;  %v183_v36 = vpop.f32.mrf.mxu3 }
  0xb9   :  { %v168_v39 = vpop.f32.mrf.mxu0  ;;  %v220_v47 = vadd.f32 %v204_v37, %v183_v36 }
  0xba   :  { %v836_v41 = vpop.eup %835  ;;  %839 = vtanh.f32 %v218_v35  ;;  %v215_v42 = vadd.f32 %v199_v31, %v168_v39  ;;  %v174_v43 = vpop.f32.mrf.mxu1 }
  0xbb   :  { %v838_v44 = vpop.eup %837  ;;  %v217_v45 = vadd.f32 %v201_v33, %v174_v43  ;;  %v234_v46 = vmul.f32 %v836_v41, %v834_v34 }
  0xbc   :  { %841 = vtanh.f32 %v215_v42  ;;  %v236_v49 = vmul.f32 %v838_v44, %v834_v34 }
  0xbd   :  { %843 = vtanh.f32 %v217_v45  ;;  %v242_v50 = vsel %vm99_vm0, %v234_v46, 0.0 }
  0xbe   :  { %243 = vadd.xlane.f32.xlu0 %v242_v50  ;;  %v248_v52 = vsel %vm99_vm0, %v236_v49, 0.0  ;;  %845 = vtanh.f32 %v220_v47 }
  0xbf   :  { %v180_v53 = vpop.f32.mrf.mxu2  ;;  %249 = vadd.xlane.f32.xlu1 %v248_v52  ;;  %v381_v52 = vperm.slane %v344_v19, 5 }
  0xc0   :  { %v840_v54 = vpop.eup %839  ;;  %v219_v55 = vadd.f32 %v203_v48, %v180_v53  ;;  %v186_v56 = vpop.f32.mrf.mxu3 }
  0xc1   :  { %v221_v57 = vadd.f32 %v205_v51, %v186_v56  ;;  %v238_v58 = vmul.f32 %v840_v54, %v834_v34  ;;  %v1043_v54 = vmov 0  }
  0xc2   :  { %v842_v59 = vpop.eup %841  ;;  %847 = vtanh.f32 %v219_v55 }
  0xc3   :  { %v844_v60 = vpop.eup %843  ;;  %849 = vtanh.f32 %v221_v57  ;;  %v254_v61 = vsel %vm99_vm0, %v238_v58, 0.0  ;;  %v235_v62 = vmul.f32 %v842_v59, %v834_v34 }
  0xc4   :  { %255 = vadd.xlane.f32.xlu2 %v254_v61  ;;  %v237_v63 = vmul.f32 %v844_v60, %v834_v34  ;;  %v846_v1 = vpop.eup %845 }
  0xc5   :  { %v245_v0 = vsel %vm99_vm0, %v235_v62, 0.0  ;;  %v240_v6 = vmul.f32 %v846_v1, %v834_v34 }
  0xc6   :  { %246 = vadd.xlane.f32.xlu0 %v245_v0  ;;  %v251_v2 = vsel %vm99_vm0, %v237_v63, 0.0 }
  0xc7   :  { %252 = vadd.xlane.f32.xlu1 %v251_v2  ;;  %v260_v18 = vsel %vm99_vm0, %v240_v6, 0.0 }
  0xc8   :  { %v848_v3 = vpop.eup %847 }
  0xc9   :  { %v850_v4 = vpop.eup %849  ;;  %v239_v5 = vmul.f32 %v848_v3, %v834_v34 }
  0xca   :  { %v241_v7 = vmul.f32 %v850_v4, %v834_v34 }
  0xcb   :  { %v257_v16 = vsel %vm99_vm0, %v239_v5, 0.0 }
  0xcc   :  { %258 = vadd.xlane.f32.xlu2 %v257_v16  ;;  %v263_v17 = vsel %vm99_vm0, %v241_v7, 0.0 }
  0xce   :  { %261 = vadd.xlane.f32.xlu0 %v260_v18 }
  0xcf   :  { %264 = vadd.xlane.f32.xlu1 %v263_v17 }
  0xe2   :  { %351 = vperm.xlu0 %828, %v346_v24  }
  0xe4   :  { %365 = vperm.xlu2 %830, %v360_v21  }
  0xe8   :  { %358 = vperm.xlu1 %829, %v353_v23  }
  0xea   :  { %400 = vperm.xlu0 %828, %v395_v26  }
  0xec   :  { %372 = vperm.xlu2 %830, %v367_v22  }
  0xf0   :  { %379 = vperm.xlu1 %829, %v374_v25  }
  0xf2   :  { %833 = vset.pattern.permute.xlu0 %v1043_v54 }
  0xf8   :  { %393 = vperm.xlu1 %829, %v388_v28  }
 0x100   :  { %832 = vset.pattern.permute.xlu1 %v1043_v54 }
 0x131   :  { %v244_v27 = vpop.xlane.xlu0 %243 }
 0x132   :  { %v250_v29 = vpop.xlane.xlu1 %249  ;;  %v276_v33 = vperm.slane %v244_v27, %v1170_v30 }
 0x133   :  { %v278_v36 = vperm.slane %v250_v29, %v1170_v30 }
 0x137   :  { %v256_v31 = vpop.xlane.xlu2 %255 }
 0x138   :  { %v280_v40 = vperm.slane %v256_v31, %v1170_v30 }
 0x139   :  { %v247_v32 = vpop.xlane.xlu0 %246 }
 0x13a   :  { %v277_v34 = vperm.slane %v247_v32, %v1170_v30  ;;  %v253_v35 = vpop.xlane.xlu1 %252 }
 0x13b   :  { %v279_v37 = vperm.slane %v253_v35, %v1170_v30 }
 0x13c   :  { %v285_v38 = vsel %vm284_vm1, %v277_v34, %v276_v33 }
 0x13d   :  { %v287_v39 = vsel %vm286_vm2, %v278_v36, %v285_v38 }
 0x13e   :  { %v289_v20 = vsel %vm288_vm3, %v279_v37, %v287_v39 }
 0x13f   :  { %v259_v41 = vpop.xlane.xlu2 %258  ;;  %v291_v44 = vsel %vm290_vm4, %v280_v40, %v289_v20 }
 0x140   :  { %v281_v42 = vperm.slane %v259_v41, %v1170_v30 }
 0x141   :  { %v262_v43 = vpop.xlane.xlu0 %261 }
 0x142   :  { %v282_v45 = vperm.slane %v262_v43, %v1170_v30  ;;  %v265_v46 = vpop.xlane.xlu1 %264  ;;  %v293_v47 = vsel %vm292_vm5, %v281_v42, %v291_v44 }
 0x143   :  { %v283_v48 = vperm.slane %v265_v46, %v1170_v30 }
 0x144   :  { %v295_v49 = vsel %vm1393_vm6, %v282_v45, %v293_v47 }
 0x145   :  { %v297_v50 = vsel %vm1392_vm7, %v283_v48, %v295_v49 }
 0x146   :  { %v300_v51 = vsel %vm1391_vm8, %v297_v50, -inf }
 0x147   :  { %301 = vmax.xlane.f32.xlu2 %v300_v51  ;;  %v366_v53 = vpop.permute.xlu2 %365 }
 0x14f   :  { %v373_v55 = vpop.permute.xlu2 %372 }
 0x154   :  { %v352_v21 = vpop.permute.xlu0 %351 }
 0x15a   :  { %v359_v18 = vpop.permute.xlu1 %358 }
 0x15c   :  { %v401_v39 = vpop.permute.xlu0 %400 }
 0x15f   :  { %386 = vperm.xlu2 %830, %v381_v52  }
 0x167   :  { %831 = vset.pattern.permute.xlu2 %v1043_v54 }
 0x1ba   :  { %v302_v56 = vpop.xlane.xlu2 %301 }
 0x1bb   :  { %v304_v57 = vperm.slane %v302_v56, 0  ;;  %v306_v58 = vperm.slane %v302_v56, 2  ;;  %v305_v59 = vperm.slane %v302_v56, 1  ;;  %v307_v60 = vperm.slane %v302_v56, 3 }
 0x1bc   :  { %v311_v1 = vperm.slane %v302_v56, 7  ;;  %v308_v3 = vperm.slane %v302_v56, 4  ;;  %v309_v6 = vperm.slane %v302_v56, 5  ;;  %v310_v26 = vperm.slane %v302_v56, 6 }
 0x1bd   :  { %v320_v61 = vsub.f32 %v244_v27, %v304_v57  ;;  %v322_v62 = vsub.f32 %v250_v29, %v306_v58  ;;  %v321_v0 = vsub.f32 %v247_v32, %v305_v59  ;;  %v323_v2 = vsub.f32 %v253_v35, %v307_v60  ;;  %v380_v35 = vpop.permute.xlu1 %379 }
 0x1be   :  { %v327_v7 = vsub.f32 %v265_v46, %v311_v1  ;;  %v324_v17 = vsub.f32 %v256_v31, %v308_v3  ;;  %v325_v22 = vsub.f32 %v259_v41, %v309_v6  ;;  %v326_v31 = vsub.f32 %v262_v43, %v310_v26 }
 0x1bf   :  { %v328_v63 = vmul.f32 1.442695, %v320_v61  ;;  %v332_v4 = vmul.f32 1.442695, %v322_v62  ;;  %v330_v5 = vmul.f32 1.442695, %v321_v0 }
 0x1c0   :  { %v334_v16 = vmul.f32 1.442695, %v323_v2  ;;  %v342_v23 = vmul.f32 1.442695, %v327_v7  ;;  %v336_v24 = vmul.f32 1.442695, %v324_v17 }
 0x1c1   :  { %851 = vpow2.f32 %v328_v63  ;;  %v338_v28 = vmul.f32 1.442695, %v325_v22  ;;  %v340_v36 = vmul.f32 1.442695, %v326_v31 }
 0x1c2   :  { %853 = vpow2.f32 %v332_v4  ;;  %v387_v43 = vpop.permute.xlu2 %386 }
 0x1c3   :  { %855 = vpow2.f32 %v330_v5 }
 0x1c4   :  { %857 = vpow2.f32 %v334_v16 }
 0x1c5   :  { %859 = vpow2.f32 %v342_v23  ;;  %v394_v46 = vpop.permute.xlu1 %393 }
 0x1c6   :  { %861 = vpow2.f32 %v336_v24 }
 0x1c7   :  { %v852_v19 = vpop.eup %851  ;;  %863 = vpow2.f32 %v338_v28 }
 0x1c8   :  { %v1188_v25 = vmul.f32 %v852_v19, %v352_v21  ;;  %v854_v27 = vpop.eup %853  ;;  %865 = vpow2.f32 %v340_v36 }
 0x1c9   :  { %v856_v29 = vpop.eup %855  ;;  %v1191_v32 = vmul.f32 %v854_v27, %v366_v53 }
 0x1ca   :  { %427 = vperm.xlu2 %831, %v1188_v25   ;;  %v858_v33 = vpop.eup %857  ;;  %v1193_v34 = vmul.f32 %v856_v29, %v359_v18 }
 0x1cb   :  { %433 = vperm.xlu0 %833, %v1191_v32   ;;  %v1197_v37 = vmul.f32 %v858_v33, %v373_v55  ;;  %v860_v38 = vpop.eup %859 }
 0x1cc   :  { %430 = vperm.xlu1 %832, %v1193_v34   ;;  %v862_v20 = vpop.eup %861  ;;  %v1200_v40 = vmul.f32 %v860_v38, %v401_v39 }
 0x1cd   :  { %v864_v41 = vpop.eup %863  ;;  %v1202_v42 = vmul.f32 %v862_v20, %v380_v35 }
 0x1ce   :  { %v1206_v44 = vmul.f32 %v864_v41, %v387_v43  ;;  %v866_v45 = vpop.eup %865 }
 0x1cf   :  { %v1209_v47 = vmul.f32 %v866_v45, %v394_v46 }
 0x1d2   :  { %436 = vperm.xlu2 %831, %v1197_v37  }
 0x1d3   :  { %448 = vperm.xlu0 %833, %v1200_v40  }
 0x1d4   :  { %439 = vperm.xlu1 %832, %v1202_v42  }
 0x1da   :  { %442 = vperm.xlu2 %831, %v1206_v44  }
 0x1dc   :  { %445 = vperm.xlu1 %832, %v1209_v47  }
 0x224   :  { %v428_v48 = vpop.permute.xlu2 %427 }
 0x225   :  { %v450_v53 = vperm.slane %v428_v48, %v1170_v30 }
 0x22c   :  { %v437_v50 = vpop.permute.xlu2 %436 }
 0x22d   :  { %v453_v59 = vperm.slane %v437_v50, %v1170_v30 }
 0x234   :  { %v443_v60 = vpop.permute.xlu2 %442 }
 0x235   :  { %v455_v0 = vperm.slane %v443_v60, %v1170_v30 }
 0x23d   :  { %v434_v52 = vpop.permute.xlu0 %433 }
 0x23e   :  { %v431_v49 = vpop.permute.xlu1 %430  ;;  %v452_v54 = vperm.slane %v434_v52, %v1170_v30 }
 0x23f   :  { %v451_v51 = vperm.slane %v431_v49, %v1170_v30 }
 0x241   :  { %v458_v55 = vsel %vm284_vm1, %v451_v51, %v450_v53 }
 0x242   :  { %v459_v57 = vsel %vm286_vm2, %v452_v54, %v458_v55 }
 0x243   :  { %v460_v61 = vsel %vm288_vm3, %v453_v59, %v459_v57 }
 0x245   :  { %v449_v63 = vpop.permute.xlu0 %448 }
 0x246   :  { %v440_v56 = vpop.permute.xlu1 %439  ;;  %v457_v3 = vperm.slane %v449_v63, %v1170_v30 }
 0x247   :  { %v454_v58 = vperm.slane %v440_v56, %v1170_v30 }
 0x249   :  { %v461_v62 = vsel %vm290_vm4, %v454_v58, %v460_v61 }
 0x24a   :  { %v462_v4 = vsel %vm292_vm5, %v455_v0, %v461_v62 }
 0x24e   :  { %v446_v1 = vpop.permute.xlu1 %445 }
 0x24f   :  { %v456_v2 = vperm.slane %v446_v1, %v1170_v30 }
 0x251   :  { %v463_v5 = vsel %vm1393_vm6, %v456_v2, %v462_v4 }
 0x252   :  { %v464_v6 = vsel %vm1392_vm7, %v457_v3, %v463_v5 }
 0x253   :  { %v466_v7 = vsel %vm1391_vm8, %v464_v6, 0.0 }
 0x254   :  { %467 = vadd.xlane.f32.xlu2 %v466_v7 }
 0x2c7   :  { %v468_v16 = vpop.xlane.xlu2 %467 }
 0x2c8   :  { %v470_v17 = vperm.slane %v468_v16, 0  ;;  %v471_v18 = vperm.slane %v468_v16, 1  ;;  %v1228_v19 = vperm.slane %v468_v16, 2  ;;  %v1230_v21 = vperm.slane %v468_v16, 3 }
 0x2c9   :  { %v1232_v22 = vperm.slane %v468_v16, 4  ;;  %v1234_v23 = vperm.slane %v468_v16, 5  ;;  %v1240_v29 = vperm.slane %v468_v16, 7  ;;  %v1242_v35 = vperm.slane %v468_v16, 6 }
 0x2ca   :  { %867 = vrcp.f32 %v470_v17  ;;  %v510_v24 = vand.u32 2147483647, %v471_v18  ;;  %v512_v26 = vand.u32 2147483648, %v471_v18  ;;  %v495_v27 = vand.u32 2147483647, %v470_v17 }
 0x2cb   :  { %869 = vrcp.f32 %v471_v18  ;;  %v497_v31 = vand.u32 2147483648, %v470_v17  ;;  %vm506_vm9 = vweird.f32 %v471_v18  ;;  %vm491_vm11 = vweird.f32 %v470_v17 }
 0x2cc   :  { %871 = vrcp.f32 %v1228_v19  ;;  %vm1246_vm10 = vcmp.eq.f32.partialorder %v510_v24, 8.507059e+37  ;;  %v513_v43 = vor.u32 1.1754944e-38, %v512_v26  ;;  %vm1252_vm12 = vcmp.eq.f32.partialorder %v495_v27, 8.507059e+37 }
 0x2cd   :  { %873 = vrcp.f32 %v1230_v21  ;;  %v498_v51 = vor.u32 1.1754944e-38, %v497_v31  ;;  %v542_v61 = vand.u32 2147483648, %v1230_v21  ;;  %v527_v63 = vand.u32 2147483648, %v1228_v19 }
 0x2ce   :  { %875 = vrcp.f32 %v1232_v22  ;;  %v525_v26 = vand.u32 2147483647, %v1228_v19 }
 0x2cf   :  { %877 = vrcp.f32 %v1234_v23 }
 0x2d0   :  { %v868_v28 = vpop.eup %867  ;;  %879 = vrcp.f32 %v1240_v29 }
 0x2d1   :  { %v870_v33 = vpop.eup %869  ;;  %v487_v36 = vmul.f32 %v868_v28, %v470_v17  ;;  %vm492_vm13 = vweird.f32 %v868_v28  ;;  %881 = vrcp.f32 %v1242_v35 }
 0x2d2   :  { %v1244_v38 = vpop.eup %871  ;;  %v502_v39 = vmul.f32 %v870_v33, %v471_v18  ;;  %vm507_vm14 = vweird.f32 %v870_v33  ;;  %vm493_vm15 = vmor %vm491_vm11, %vm492_vm13  ;;  %vm536_vm11 = vweird.f32 %v1230_v21 }
 0x2d3   :  { %v1250_v41 = vpop.eup %873  ;;  %v488_v45 = vsub.f32 1.0, %v487_v36  ;;  %v517_v48 = vmul.f32 %v1244_v38, %v1228_v19  ;;  %vm522_vm8 = vweird.f32 %v1244_v38  ;;  %vm508_vm7 = vmor %vm506_vm9, %vm507_vm14  ;;  %vm521_vm9 = vweird.f32 %v1228_v19 }
 0x2d4   :  { %v1258_v49 = vpop.eup %875  ;;  %v503_v50 = vsub.f32 1.0, %v502_v39  ;;  %v532_v52 = vmul.f32 %v1250_v41, %v1230_v21  ;;  %vm537_vm6 = vweird.f32 %v1250_v41  ;;  %v528_v19 = vor.u32 1.1754944e-38, %v527_v63 }
 0x2d5   :  { %v1263_v53 = vpop.eup %877  ;;  %v489_v54 = vmul.f32 %v868_v28, %v488_v45  ;;  %v518_v55 = vsub.f32 1.0, %v517_v48  ;;  %v547_v56 = vmul.f32 %v1258_v49, %v1232_v22  ;;  %v543_v39 = vor.u32 1.1754944e-38, %v542_v61 }
 0x2d6   :  { %v504_v57 = vmul.f32 %v870_v33, %v503_v50  ;;  %v533_v58 = vsub.f32 1.0, %v532_v52  ;;  %v562_v59 = vmul.f32 %v1263_v53, %v1234_v23  ;;  %v1279_v5 = vpop.eup %879  ;;  %vm567_vm13 = vweird.f32 %v1263_v53 }
 0x2d7   :  { %v490_v60 = vadd.f32 %v868_v28, %v489_v54  ;;  %v519_v62 = vmul.f32 %v1244_v38, %v518_v55  ;;  %v548_v4 = vsub.f32 1.0, %v547_v56  ;;  %v557_v48 = vand.u32 2147483648, %v1232_v22 }
 0x2d8   :  { %v505_v0 = vadd.f32 %v870_v33, %v504_v57  ;;  %v534_v1 = vmul.f32 %v1250_v41, %v533_v58  ;;  %v563_v17 = vsub.f32 1.0, %v562_v59  ;;  %vm551_vm14 = vweird.f32 %v1232_v22 }
 0x2d9   :  { %v494_v2 = vsel %vm493_vm15, %v868_v28, %v490_v60  ;;  %v520_v3 = vadd.f32 %v1244_v38, %v519_v62  ;;  %v540_v28 = vand.u32 2147483647, %v1230_v21  ;;  %v592_v21 = vmul.f32 %v1279_v5, %v1240_v29 }
 0x2da   :  { %v509_v6 = vsel %vm508_vm7, %v870_v33, %v505_v0  ;;  %v499_v7 = vsel %vm1252_vm12, %v498_v51, %v494_v2  ;;  %v535_v16 = vadd.f32 %v1250_v41, %v534_v1  ;;  %vm523_vm7 = vmor %vm521_vm9, %vm522_vm8  ;;  %v1298_v33 = vpop.eup %881  ;;  %v564_v36 = vmul.f32 %v1263_v53, %v563_v17 }
 0x2db   :  { %v514_v24 = vsel %vm1246_vm10, %v513_v43, %v509_v6  ;;  %v500_v18 = vmul.f32 %v499_v7, %v1188_v25  ;;  %vm538_vm12 = vmor %vm536_vm11, %vm537_vm6  ;;  %v524_v31 = vsel %vm523_vm7, %v1244_v38, %v520_v3  ;;  %v549_v25 = vmul.f32 %v1258_v49, %v548_v4 }
 0x2dc   :  { %v515_v27 = vmul.f32 %v514_v24, %v1193_v34  ;;  %v539_v34 = vsel %vm538_vm12, %v1250_v41, %v535_v16  ;;  %vm526_vm8 = vcmp.eq.f32.partialorder %v525_v26, 8.507059e+37  ;;  %vm541_vm10 = vcmp.eq.f32.partialorder %v540_v28, 8.507059e+37 }
 0x2dd   :  { %608 = vperm.xlu1 %832, %v500_v18   ;;  %v529_v20 = vsel %vm526_vm8, %v528_v19, %v524_v31  ;;  %v572_v43 = vand.u32 2147483648, %v1234_v23  ;;  %v544_v38 = vsel %vm541_vm10, %v543_v39, %v539_v34  ;;  %v550_v45 = vadd.f32 %v1258_v49, %v549_v25 }
 0x2de   :  { %613 = vperm.xlu0 %833, %v515_v27   ;;  %vm552_vm6 = vweird.f32 %v1258_v49  ;;  %v577_v41 = vmul.f32 %v1298_v33, %v1242_v35  ;;  %v565_v46 = vadd.f32 %v1263_v53, %v564_v36  ;;  %v593_v50 = vsub.f32 1.0, %v592_v21 }
 0x2df   :  { %v530_v51 = vmul.f32 %v529_v20, %v1191_v32  ;;  %v555_v52 = vand.u32 2147483647, %v1232_v22  ;;  %v545_v55 = vmul.f32 %v544_v38, %v1197_v37  ;;  %vm566_vm15 = vweird.f32 %v1234_v23  ;;  %vm553_vm9 = vmor %vm551_vm14, %vm552_vm6 }
 0x2e0   :  { %v578_v54 = vsub.f32 1.0, %v577_v41  ;;  %v570_v56 = vand.u32 2147483647, %v1234_v23  ;;  %vm568_vm11 = vmor %vm566_vm15, %vm567_vm13  ;;  %v554_v57 = vsel %vm553_vm9, %v1258_v49, %v550_v45  ;;  %v558_v59 = vor.u32 1.1754944e-38, %v557_v48 }
 0x2e1   :  { %v569_v32 = vsel %vm568_vm11, %v1263_v53, %v565_v46  ;;  %v594_v22 = vmul.f32 %v1279_v5, %v593_v50  ;;  %v573_v60 = vor.u32 1.1754944e-38, %v572_v43  ;;  %vm556_vm7 = vcmp.eq.f32.partialorder %v555_v52, 8.507059e+37 }
 0x2e2   :  { %v579_v58 = vmul.f32 %v1298_v33, %v578_v54  ;;  %vm571_vm12 = vcmp.eq.f32.partialorder %v570_v56, 8.507059e+37  ;;  %v559_v37 = vsel %vm556_vm7, %v558_v59, %v554_v57  ;;  %vm582_vm8 = vweird.f32 %v1298_v33 }
 0x2e3   :  { %v574_v61 = vsel %vm571_vm12, %v573_v60, %v569_v32  ;;  %v595_v62 = vadd.f32 %v1279_v5, %v594_v22  ;;  %vm597_vm10 = vweird.f32 %v1279_v5  ;;  %v587_v49 = vand.u32 2147483648, %v1242_v35 }
 0x2e4   :  { %v580_v23 = vadd.f32 %v1298_v33, %v579_v58  ;;  %v560_v53 = vmul.f32 %v559_v37, %v1202_v42  ;;  %v602_v63 = vand.u32 2147483648, %v1240_v29  ;;  %vm581_vm6 = vweird.f32 %v1242_v35 }
 0x2e5   :  { %618 = vperm.xlu1 %832, %v530_v51   ;;  %v585_v0 = vand.u32 2147483647, %v1242_v35  ;;  %v575_v1 = vmul.f32 %v574_v61, %v1206_v44  ;;  %vm596_vm13 = vweird.f32 %v1240_v29  ;;  %v600_v2 = vand.u32 2147483647, %v1240_v29  ;;  %vm583_vm14 = vmor %vm581_vm6, %vm582_vm8 }
 0x2e6   :  { %623 = vperm.xlu0 %833, %v545_v55   ;;  %vm598_vm15 = vmor %vm596_vm13, %vm597_vm10  ;;  %v584_v3 = vsel %vm583_vm14, %v1298_v33, %v580_v23  ;;  %v588_v4 = vor.u32 1.1754944e-38, %v587_v49  ;;  %v603_v6 = vor.u32 1.1754944e-38, %v602_v63  ;;  %vm1398_vm7 = vcmask 1046534  }
 0x2e7   :  { %v599_v42 = vsel %vm598_vm15, %v1279_v5, %v595_v62  ;;  %vm586_vm9 = vcmp.eq.f32.partialorder %v585_v0, 8.507059e+37  ;;  %vm601_vm11 = vcmp.eq.f32.partialorder %v600_v2, 8.507059e+37  ;;  %vm1399_vm12 = vcmask 1047559  }
 0x2e8   :  { %v589_v7 = vsel %vm586_vm9, %v588_v4, %v584_v3  ;;  %v604_v35 = vsel %vm601_vm11, %v603_v6, %v599_v42  ;;  %vm1400_vm8 = vcmask 64512  }
 0x2e9   :  { %v590_v44 = vmul.f32 %v589_v7, %v1209_v47  ;;  %v605_v16 = vmul.f32 %v604_v35, %v1200_v40 }
 0x2ed   :  { %628 = vperm.xlu1 %832, %v560_v53  }
 0x2ee   :  { %633 = vperm.xlu0 %833, %v575_v1  }
 0x2f5   :  { %638 = vperm.xlu1 %832, %v590_v44  }
 0x2f6   :  { %643 = vperm.xlu0 %833, %v605_v16  }
 0x34f   :  { %v609_v29 = vpop.permute.xlu1 %608 }
 0x350   :  { %v614_v17 = vpop.permute.xlu0 %613  ;;  %v646_v24 = vmul.f32 %v609_v29, %v1123_v8  ;;  %v727_v20 = vperm.slane %v609_v29, %v1170_v30 }
 0x351   :  { %v647_v18 = vmul.f32 %v614_v17, %v1141_v12  ;;  %v728_v39 = vperm.slane %v614_v17, %v1170_v30 }
 0x352   :  { %v654_v5 = vsel %vm99_vm0, %v646_v24, 0.0 }
 0x353   :  { %v661_v26 = vsel %vm99_vm0, %v647_v18, 0.0  ;;  %v655_v27 = vrot.slane %v654_v5, 4  ;;  %v735_v50 = vsel %vm284_vm1, %v728_v39, %v727_v20 }
 0x354   :  { %v662_v28 = vrot.slane %v661_v26, 4 }
 0x355   :  { %v656_v25 = vadd.f32 %v655_v27, %v654_v5 }
 0x356   :  { %v663_v31 = vadd.f32 %v662_v28, %v661_v26 }
 0x357   :  { %v619_v33 = vpop.permute.xlu1 %618  ;;  %v657_v8 = vrot.slane %v656_v25, 2 }
 0x358   :  { %v624_v47 = vpop.permute.xlu0 %623  ;;  %v648_v40 = vmul.f32 %v619_v33, %v1129_v10  ;;  %v664_v36 = vrot.slane %v663_v31, 2  ;;  %v729_v45 = vperm.slane %v619_v33, %v1170_v30 }
 0x359   :  { %v649_v34 = vmul.f32 %v624_v47, %v1145_v14  ;;  %v658_v10 = vadd.f32 %v657_v8, %v656_v25  ;;  %v730_v51 = vperm.slane %v624_v47, %v1170_v30 }
 0x35a   :  { %v668_v19 = vsel %vm99_vm0, %v648_v40, 0.0  ;;  %v665_v46 = vadd.f32 %v664_v36, %v663_v31  ;;  %v736_v56 = vsel %vm286_vm2, %v729_v45, %v735_v50 }
 0x35b   :  { %v675_v12 = vsel %vm99_vm0, %v649_v34, 0.0  ;;  %v669_v21 = vrot.slane %v668_v19, 4  ;;  %v659_v60 = vrot.slane %v658_v10, 1 }
 0x35c   :  { %v676_v43 = vrot.slane %v675_v12, 4  ;;  %v666_v22 = vrot.slane %v665_v46, 1 }
 0x35d   :  { %v670_v38 = vadd.f32 %v669_v21, %v668_v19  ;;  %v660_v2 = vadd.f32 %v659_v60, %v658_v10 }
 0x35e   :  { %v677_v41 = vadd.f32 %v676_v43, %v675_v12  ;;  %v667_v1 = vadd.f32 %v666_v22, %v665_v46 }
 0x35f   :  { %v671_v48 = vrot.slane %v670_v38, 2  ;;  %v629_v14 = vpop.permute.xlu1 %628 }
 0x360   :  { %v634_v52 = vpop.permute.xlu0 %633  ;;  %v650_v54 = vmul.f32 %v629_v14, %v1125_v9  ;;  %v678_v55 = vrot.slane %v677_v41, 2  ;;  %v731_v58 = vperm.slane %v629_v14, %v1170_v30  ;;  %v737_v9 = vsel %vm288_vm3, %v730_v51, %v736_v56 }
 0x361   :  { %v651_v57 = vmul.f32 %v634_v52, %v1143_v13  ;;  %v672_v32 = vadd.f32 %v671_v48, %v670_v38  ;;  %v732_v62 = vperm.slane %v634_v52, %v1170_v30 }
 0x362   :  { %v682_v59 = vsel %vm99_vm0, %v650_v54, 0.0  ;;  %v679_v49 = vadd.f32 %v678_v55, %v677_v41  ;;  %v738_v63 = vsel %vm290_vm4, %v731_v58, %v737_v9 }
 0x363   :  { %v689_v37 = vsel %vm99_vm0, %v651_v57, 0.0  ;;  %v683_v61 = vrot.slane %v682_v59, 4  ;;  %v673_v13 = vrot.slane %v672_v32, 1  ;;  %v739_v7 = vsel %vm292_vm5, %v732_v62, %v738_v63 }
 0x364   :  { %v690_v23 = vrot.slane %v689_v37, 4  ;;  %v680_v16 = vrot.slane %v679_v49, 1 }
 0x365   :  { %v684_v53 = vadd.f32 %v683_v61, %v682_v59  ;;  %v674_v18 = vadd.f32 %v673_v13, %v672_v32 }
 0x366   :  { %v691_v0 = vadd.f32 %v690_v23, %v689_v37  ;;  %v681_v47 = vadd.f32 %v680_v16, %v679_v49 }
 0x367   :  { %v685_v3 = vrot.slane %v684_v53, 2  ;;  %v639_v42 = vpop.permute.xlu1 %638 }
 0x368   :  { %v692_v4 = vrot.slane %v691_v0, 2  ;;  %v644_v6 = vpop.permute.xlu0 %643  ;;  %v652_v35 = vmul.f32 %v639_v42, %v1131_v11  ;;  %v733_v44 = vperm.slane %v639_v42, %v1170_v30 }
 0x369   :  { %v686_v29 = vadd.f32 %v685_v3, %v684_v53  ;;  %v653_v17 = vmul.f32 %v644_v6, %v1147_v15  ;;  %v734_v24 = vperm.slane %v644_v6, %v1170_v30  ;;  %v718_v30 = vsel %vm284_vm1, %v667_v1, %v660_v2  ;;  %vm1401_vm1 = vmmov %vm1398_vm7 }
 0x36a   :  { %v693_v5 = vadd.f32 %v692_v4, %v691_v0  ;;  %v696_v26 = vsel %vm99_vm0, %v652_v35, 0.0  ;;  %v740_v27 = vsel %vm1398_vm7, %v733_v44, %v739_v7  ;;  %v719_v19 = vsel %vm286_vm2, %v674_v18, %v718_v30  ;;  %vm1402_vm2 = vmmov %vm1399_vm12 }
 0x36b   :  { %v687_v28 = vrot.slane %v686_v29, 1  ;;  %v703_v31 = vsel %vm99_vm0, %v653_v17, 0.0  ;;  %v697_v11 = vrot.slane %v696_v26, 4  ;;  %v741_v25 = vsel %vm1399_vm12, %v734_v24, %v740_v27 }
 0x36c   :  { %v704_v33 = vrot.slane %v703_v31, 4  ;;  %743 = vst.msk [vmem:[#allocation11] sm:$0xff] %vm1400_vm8, %v741_v25  ;;  %v694_v40 = vrot.slane %v693_v5, 1  ;;  %v720_v43 = vsel %vm288_vm3, %v681_v47, %v719_v19 }
 0x36d   :  { %v698_v15 = vadd.f32 %v697_v11, %v696_v26  ;;  %765 = dma.vmem_to_hbm [thread:$0]  %s761_s17, 128, %s763_s20, [#allocation12]   ;;  %v688_v36 = vadd.f32 %v687_v28, %v686_v29 }
 0x36e   :  { %v705_v34 = vadd.f32 %v704_v33, %v703_v31  ;;  %v695_v39 = vadd.f32 %v694_v40, %v693_v5 }
 0x36f   :  { %v699_v8 = vrot.slane %v698_v15, 2  ;;  %v721_v45 = vsel %vm290_vm4, %v688_v36, %v720_v43 }
 0x370   :  { %v706_v12 = vrot.slane %v705_v34, 2  ;;  %v722_v48 = vsel %vm292_vm5, %v695_v39, %v721_v45 }
 0x371   :  { %v700_v21 = vadd.f32 %v699_v8, %v698_v15 }
 0x372   :  { %v707_v20 = vadd.f32 %v706_v12, %v705_v34 }
 0x373   :  { %v701_v38 = vrot.slane %v700_v21, 1 }
 0x374   :  { %v708_v41 = vrot.slane %v707_v20, 1 }
 0x375   :  { %v702_v46 = vadd.f32 %v701_v38, %v700_v21 }
 0x376   :  { %v709_v10 = vadd.f32 %v708_v41, %v707_v20 }
 0x377   :  { %v723_v14 = vsel %vm1401_vm1, %v702_v46, %v722_v48 }
 0x378   :  { %v724_v50 = vsel %vm1402_vm2, %v709_v10, %v723_v14 }
 0x379   :  { %726 = vst.msk [vmem:[#allocation10] sm:$0xff] %vm99_vm0, %v724_v50 }
 0x37a   :  { %754 = dma.vmem_to_hbm [thread:$0]  %s750_s21, 128, %s752_s24, [#allocation4]  }
 0x37b   :  { %1033 = dma.done.wait [#allocation4], 128  }
 0x37c   :  { %1034 = vsyncadd [#allocation4], 4294967168 }
 0x37d   :  { %1035 = dma.done.wait [#allocation12], 128  }
 0x37e   :  { %1036 = vsyncadd [#allocation12], 4294967168 }
 0x37f   :  { %774 = vsyncpa [#allocation3], 1 }
 0x380   :  { %775 = vsyncpa [#allocation6], 1 }
 0x381   :  { %776 = vsyncpa [#allocation9], 1 }
 0x382   :  { %777 = vsyncpa [#allocation4], 1 }
 0x383   :  { %778 = vsyncpa [#allocation12], 1 }

</bundles_post_ra>
